<compile_context>
chip_gen: v7x
topology: tpu7x:2x2x1
jax: 0.10.0
libtpu: 0.0.40
codegen_flags: <defaults>
</compile_context>

<pallas_src>
import jax
import jax.numpy as jnp
from jax.experimental import pallas as pl
from jax.experimental.pallas import tpu as pltpu


# ----------------------------------------------------------------------------
# Kernel
# ----------------------------------------------------------------------------
def swiglu_kernel(x_ref, wg_ref, wv_ref, bg_ref, bv_ref, o_ref, acc_g, acc_v):
    """Computes one (TM, TN) output tile, accumulating over the K grid axis."""
    k = pl.program_id(2)

    @pl.when(k == 0)
    def _init():
        # Fold the bias into the accumulators once per output tile.
        acc_g[...] = jnp.broadcast_to(bg_ref[...], acc_g.shape)
        acc_v[...] = jnp.broadcast_to(bv_ref[...], acc_v.shape)

    xt = x_ref[...]  # (TM, TK) bf16 tile, reused by both MXU pushes.
    acc_g[...] += jnp.dot(xt, wg_ref[...], preferred_element_type=jnp.float32)
    acc_v[...] += jnp.dot(xt, wv_ref[...], preferred_element_type=jnp.float32)

    @pl.when(k == pl.num_programs(2) - 1)
    def _finalize():
        gate = acc_g[...]                       # f32
        val = acc_v[...]                        # f32
        # silu(gate) * val ; sigmoid runs on the EUP slot (free vs. VALU).
        o_ref[...] = (gate * jax.nn.sigmoid(gate) * val).astype(o_ref.dtype)


# ----------------------------------------------------------------------------
# Tiling helper: largest tile <= target that is a multiple of `align` and
# divides `dim`; otherwise fall back to the full dimension (always legal).
# ----------------------------------------------------------------------------
def _pick_tile(dim, target, align):
    if dim <= target:
        return dim
    t = (target // align) * align
    while t >= align:
        if dim % t == 0:
            return t
        t -= align
    return dim


# ----------------------------------------------------------------------------
# Wrapper
# ----------------------------------------------------------------------------
def swiglu(x, w_gate, w_value, b_gate, b_value, *,
           tm=256, tn=512, tk=512, compute_dtype=jnp.bfloat16):
    """x: (..., D); w_gate/w_value: (D, D) (already transposed so y = x @ W);
    b_gate/b_value: (D,). Returns (..., D) in x.dtype."""
    orig_shape = x.shape
    D = orig_shape[-1]
    M = 1
    for s in orig_shape[:-1]:
        M *= s

    x2 = x.reshape(M, D)
    bg2 = b_gate.reshape(1, D).astype(jnp.float32)
    bv2 = b_value.reshape(1, D).astype(jnp.float32)

    # Cast matmul operands to bf16 (MXU peak rate, half the DMA bytes);
    # biases and all elementwise math stay f32.
    if compute_dtype is not None:
        x_in = x2.astype(compute_dtype)
        wg_in = w_gate.astype(compute_dtype)
        wv_in = w_value.astype(compute_dtype)
    else:
        x_in, wg_in, wv_in = x2, w_gate, w_value

    TM = _pick_tile(M, tm, 8)      # sublane-aligned rows tile
    TN = _pick_tile(D, tn, 128)    # lane-dense output tile
    TK = _pick_tile(D, tk, 128)    # contraction tile

    grid = (M // TM, D // TN, D // TK)

    out_bytes = M * D * jnp.dtype(x.dtype).itemsize
    cost = pl.CostEstimate(
        flops=4 * M * D * D,                # two (M,D)x(D,D) matmuls
        transcendentals=M * D,              # sigmoid
        bytes_accessed=(x_in.size * x_in.dtype.itemsize
                        + wg_in.size * wg_in.dtype.itemsize
                        + wv_in.size * wv_in.dtype.itemsize
                        + bg2.nbytes + bv2.nbytes + out_bytes),
    )

    out = pl.pallas_call(
        swiglu_kernel,
        out_shape=jax.ShapeDtypeStruct((M, D), x.dtype),
        grid_spec=pltpu.PrefetchScalarGridSpec(
            num_scalar_prefetch=0,
            grid=grid,
            in_specs=[
                pl.BlockSpec((TM, TK), lambda i, j, k: (i, k)),   # x
                pl.BlockSpec((TK, TN), lambda i, j, k: (k, j)),   # W_gate
                pl.BlockSpec((TK, TN), lambda i, j, k: (k, j)),   # W_value
                pl.BlockSpec((1, TN), lambda i, j, k: (0, j)),    # b_gate
                pl.BlockSpec((1, TN), lambda i, j, k: (0, j)),    # b_value
            ],
            out_specs=pl.BlockSpec((TM, TN), lambda i, j, k: (i, j)),
            scratch_shapes=[pltpu.VMEM((TM, TN), jnp.float32),    # gate acc
                            pltpu.VMEM((TM, TN), jnp.float32)],   # value acc
        ),
        compiler_params=pltpu.CompilerParams(
            dimension_semantics=("parallel", "parallel", "arbitrary"),
        ),
        cost_estimate=cost,
    )(x_in, wg_in, wv_in, bg2, bv2)

    return out.reshape(orig_shape)


# ----------------------------------------------------------------------------
# Pure-JAX references
# ----------------------------------------------------------------------------
def swiglu_ref_f32(x, wg, wv, bg, bv):
    gate = x @ wg + bg
    val = x @ wv + bv
    return jax.nn.silu(gate) * val


def swiglu_ref_bf16(x, wg, wv, bg, bv):
    """Mirrors the kernel's compute dtype (bf16 MXU inputs, f32 accumulation)."""
    D = x.shape[-1]
    xb = x.astype(jnp.bfloat16).reshape(-1, D)
    gate = jnp.dot(xb, wg.astype(jnp.bfloat16),
                   preferred_element_type=jnp.float32).reshape(x.shape) + bg
    val = jnp.dot(xb, wv.astype(jnp.bfloat16),
                  preferred_element_type=jnp.float32).reshape(x.shape) + bv
    return jax.nn.silu(gate) * val


# ----------------------------------------------------------------------------
# Test
# ----------------------------------------------------------------------------
if __name__ == "__main__":
    def run_case(B, S, D, keys, **tile_kwargs):
        x = jax.random.normal(keys[0], (B, S, D), jnp.float32)
        # PyTorch Linear(D, 2D, bias=True): weight (2D, D), bias (2D,)
        w = 0.05 * jax.random.normal(keys[1], (2 * D, D), jnp.float32)
        b = 0.05 * jax.random.normal(keys[2], (2 * D,), jnp.float32)
        wg = w[:D, :].T      # gate half, transposed -> x @ wg
        wv = w[D:, :].T      # value half
        bg = b[:D]
        bv = b[D:]

        out = jax.block_until_ready(swiglu(x, wg, wv, bg, bv, **tile_kwargs))
        assert out.shape == (B, S, D)

        # Tight check against a reference using the same bf16 matmul inputs.
        ref_b = swiglu_ref_bf16(x, wg, wv, bg, bv)
        assert jnp.allclose(out, ref_b, rtol=1e-2, atol=1e-2), \
            f"mismatch vs bf16 reference for shape {(B, S, D)}"

        # Loose sanity check against the full-f32 module semantics.
        ref_f = swiglu_ref_f32(x, wg, wv, bg, bv)
        assert jnp.allclose(out, ref_f, rtol=1e-1, atol=1e-1), \
            f"mismatch vs f32 reference for shape {(B, S, D)}"

    key = jax.random.PRNGKey(0)
    ks = jax.random.split(key, 6)
    # Tiny case: full-extent blocks, grid (1, 1, 1).
    run_case(2, 8, 32, ks[:3])
    # Tiled case with default (large) tiles: grid (2, 1, 1).
    run_case(2, 256, 512, ks[3:])
    # Same shape, smaller tiles to exercise N tiling + K accumulation: (4,2,2).
    run_case(2, 256, 512, ks[3:], tm=128, tn=256, tk=256)

    print("KERNEL_OK")
</pallas_src>

<mosaic_0001>
module attributes {stable_mosaic.version = 11 : i64} {
  func.func @swiglu_kernel(%arg0: i32, %arg1: i32, %arg2: i32, %arg3: memref<16x32xbf16, #tpu.memory_space<vmem>>, %arg4: memref<32x32xbf16, #tpu.memory_space<vmem>>, %arg5: memref<32x32xbf16, #tpu.memory_space<vmem>>, %arg6: memref<1x32xf32, #tpu.memory_space<vmem>>, %arg7: memref<1x32xf32, #tpu.memory_space<vmem>>, %arg8: memref<16x32xf32, #tpu.memory_space<vmem>>, %arg9: memref<16x32xf32, #tpu.memory_space<vmem>>, %arg10: memref<16x32xf32, #tpu.memory_space<vmem>>) attributes {dimension_semantics = [#tpu.dimension_semantics<parallel>, #tpu.dimension_semantics<parallel>, #tpu.dimension_semantics<arbitrary>], iteration_bounds = array<i64: 1, 1, 1>, scalar_prefetch = 0 : i64, scratch_operands = 2 : i64, tpu.core_type = #tpu.core_type<tc>, window_params = [{transform_indices = @transform_0, window_bounds = array<i64: 16, 32>}, {transform_indices = @transform_1, window_bounds = array<i64: 32, 32>}, {transform_indices = @transform_2, window_bounds = array<i64: 32, 32>}, {transform_indices = @transform_3, window_bounds = array<i64: 1, 32>}, {transform_indices = @transform_4, window_bounds = array<i64: 1, 32>}, {transform_indices = @transform_5, window_bounds = array<i64: 16, 32>}]} {
    %c0_i32 = arith.constant 0 : i32
    %0 = arith.cmpi eq, %arg2, %c0_i32 : i32
    %1 = arith.extui %0 : i1 to i32
    %c0_i32_0 = arith.constant 0 : i32
    %2 = arith.cmpi ne, %1, %c0_i32_0 : i32
    scf.if %2 {
      %c0_17 = arith.constant 0 : index
      %c0_18 = arith.constant 0 : index
      %17 = vector.load %arg6[%c0_17, %c0_18] : memref<1x32xf32, #tpu.memory_space<vmem>>, vector<1x32xf32>
      %18 = vector.shape_cast %17 : vector<1x32xf32> to vector<1x32xf32>
      %19 = vector.broadcast %18 : vector<1x32xf32> to vector<16x32xf32>
      %c0_19 = arith.constant 0 : index
      %c0_20 = arith.constant 0 : index
      %20 = vector.load %arg9[%c0_19, %c0_20] : memref<16x32xf32, #tpu.memory_space<vmem>>, vector<16x32xf32>
      tpu.vector_store %arg9[%c0_19, %c0_20], %19 {strides = array<i32>} : memref<16x32xf32, #tpu.memory_space<vmem>>, vector<16x32xf32>,
      %c0_21 = arith.constant 0 : index
      %c0_22 = arith.constant 0 : index
      %21 = vector.load %arg7[%c0_21, %c0_22] : memref<1x32xf32, #tpu.memory_space<vmem>>, vector<1x32xf32>
      %22 = vector.shape_cast %21 : vector<1x32xf32> to vector<1x32xf32>
      %23 = vector.broadcast %22 : vector<1x32xf32> to vector<16x32xf32>
      %c0_23 = arith.constant 0 : index
      %c0_24 = arith.constant 0 : index
      %24 = vector.load %arg10[%c0_23, %c0_24] : memref<16x32xf32, #tpu.memory_space<vmem>>, vector<16x32xf32>
      tpu.vector_store %arg10[%c0_23, %c0_24], %23 {strides = array<i32>} : memref<16x32xf32, #tpu.memory_space<vmem>>, vector<16x32xf32>,
    } else {
    }
    %c0 = arith.constant 0 : index
    %c0_1 = arith.constant 0 : index
    %3 = vector.load %arg3[%c0, %c0_1] : memref<16x32xbf16, #tpu.memory_space<vmem>>, vector<16x32xbf16>
    %c0_2 = arith.constant 0 : index
    %c0_3 = arith.constant 0 : index
    %4 = vector.load %arg9[%c0_2, %c0_3] : memref<16x32xf32, #tpu.memory_space<vmem>>, vector<16x32xf32>
    %c0_4 = arith.constant 0 : index
    %c0_5 = arith.constant 0 : index
    %5 = vector.load %arg4[%c0_4, %c0_5] : memref<32x32xbf16, #tpu.memory_space<vmem>>, vector<32x32xbf16>
    %cst = arith.constant dense<0.000000e+00> : vector<16x32xf32>
    %6 = tpu.matmul %3, %5, %cst {dimension_numbers = #tpu.dot_dimension_numbers<[1], [0], [0], [1], [0, 0, 1, 1], [], []>} : vector<16x32xbf16>, vector<32x32xbf16>, vector<16x32xf32> -> vector<16x32xf32>
    %7 = arith.addf %4, %6 : vector<16x32xf32>
    %c0_6 = arith.constant 0 : index
    %c0_7 = arith.constant 0 : index
    %8 = vector.load %arg9[%c0_6, %c0_7] : memref<16x32xf32, #tpu.memory_space<vmem>>, vector<16x32xf32>
    tpu.vector_store %arg9[%c0_6, %c0_7], %7 {strides = array<i32>} : memref<16x32xf32, #tpu.memory_space<vmem>>, vector<16x32xf32>,
    %c0_8 = arith.constant 0 : index
    %c0_9 = arith.constant 0 : index
    %9 = vector.load %arg10[%c0_8, %c0_9] : memref<16x32xf32, #tpu.memory_space<vmem>>, vector<16x32xf32>
    %c0_10 = arith.constant 0 : index
    %c0_11 = arith.constant 0 : index
    %10 = vector.load %arg5[%c0_10, %c0_11] : memref<32x32xbf16, #tpu.memory_space<vmem>>, vector<32x32xbf16>
    %cst_12 = arith.constant dense<0.000000e+00> : vector<16x32xf32>
    %11 = tpu.matmul %3, %10, %cst_12 {dimension_numbers = #tpu.dot_dimension_numbers<[1], [0], [0], [1], [0, 0, 1, 1], [], []>} : vector<16x32xbf16>, vector<32x32xbf16>, vector<16x32xf32> -> vector<16x32xf32>
    %12 = arith.addf %9, %11 : vector<16x32xf32>
    %c0_13 = arith.constant 0 : index
    %c0_14 = arith.constant 0 : index
    %13 = vector.load %arg10[%c0_13, %c0_14] : memref<16x32xf32, #tpu.memory_space<vmem>>, vector<16x32xf32>
    tpu.vector_store %arg10[%c0_13, %c0_14], %12 {strides = array<i32>} : memref<16x32xf32, #tpu.memory_space<vmem>>, vector<16x32xf32>,
    %c0_i32_15 = arith.constant 0 : i32
    %14 = arith.cmpi eq, %arg2, %c0_i32_15 : i32
    %15 = arith.extui %14 : i1 to i32
    %c0_i32_16 = arith.constant 0 : i32
    %16 = arith.cmpi ne, %15, %c0_i32_16 : i32
    scf.if %16 {
      %c0_17 = arith.constant 0 : index
      %c0_18 = arith.constant 0 : index
      %17 = vector.load %arg9[%c0_17, %c0_18] : memref<16x32xf32, #tpu.memory_space<vmem>>, vector<16x32xf32>
      %c0_19 = arith.constant 0 : index
      %c0_20 = arith.constant 0 : index
      %18 = vector.load %arg10[%c0_19, %c0_20] : memref<16x32xf32, #tpu.memory_space<vmem>>, vector<16x32xf32>
      %19 = arith.negf %17 : vector<16x32xf32>
      %20 = math.exp %19 : vector<16x32xf32>
      %cst_21 = arith.constant 1.000000e+00 : f32
      %21 = vector.broadcast %cst_21 : f32 to vector<16x32xf32>
      %22 = arith.addf %21, %20 : vector<16x32xf32>
      %23 = arith.divf %21, %22 : vector<16x32xf32>
      %24 = arith.mulf %17, %23 : vector<16x32xf32>
      %25 = arith.mulf %24, %18 : vector<16x32xf32>
      %c0_22 = arith.constant 0 : index
      %c0_23 = arith.constant 0 : index
      %26 = vector.load %arg8[%c0_22, %c0_23] : memref<16x32xf32, #tpu.memory_space<vmem>>, vector<16x32xf32>
      tpu.vector_store %arg8[%c0_22, %c0_23], %25 {strides = array<i32>} : memref<16x32xf32, #tpu.memory_space<vmem>>, vector<16x32xf32>,
    } else {
    }
    return
  }
  func.func @transform_0(%arg0: i32, %arg1: i32, %arg2: i32) -> (i32, i32) {
    %c0_i32 = arith.constant 0 : i32
    return %arg0, %arg2 : i32, i32
  }
  func.func @transform_1(%arg0: i32, %arg1: i32, %arg2: i32) -> (i32, i32) {
    %c0_i32 = arith.constant 0 : i32
    return %arg2, %arg1 : i32, i32
  }
  func.func @transform_2(%arg0: i32, %arg1: i32, %arg2: i32) -> (i32, i32) {
    %c0_i32 = arith.constant 0 : i32
    return %arg2, %arg1 : i32, i32
  }
  func.func @transform_3(%arg0: i32, %arg1: i32, %arg2: i32) -> (i32, i32) {
    %c0_i32 = arith.constant 0 : i32
    %c0_i32_0 = arith.constant 0 : i32
    return %c0_i32, %arg1 : i32, i32
  }
  func.func @transform_4(%arg0: i32, %arg1: i32, %arg2: i32) -> (i32, i32) {
    %c0_i32 = arith.constant 0 : i32
    %c0_i32_0 = arith.constant 0 : i32
    return %c0_i32, %arg1 : i32, i32
  }
  func.func @transform_5(%arg0: i32, %arg1: i32, %arg2: i32) -> (i32, i32) {
    %c0_i32 = arith.constant 0 : i32
    return %arg0, %arg1 : i32, i32
  }
}

</mosaic_0001>

<bundles_post_ra>
// kernel: tpu_custom_call.1
= control target key start
LH: loop header
LB: loop body
LE: loop exit
PB: predicated region body
PF: predicated region fallthrough
CT: control target
= control target key end

     0   :  { %10 = vsyncpa [#allocation5], 0  ;;  %s538_s0 = inlined_call_operand.hbm [shape: bf16[16,32], index: 0, kind: input, shape index: {}]   ;;  %s539_s1 = inlined_call_operand.hbm [shape: bf16[32,32], index: 1, kind: input, shape index: {}]   ;;  %s540_s2 = inlined_call_operand.hbm [shape: bf16[32,32], index: 2, kind: input, shape index: {}]   ;;  %s541_s3 = inlined_call_operand.vmem [shape: f32[1,32], index: 3, kind: input, shape index: {}]   ;;  %s542_s4 = inlined_call_operand.vmem [shape: f32[1,32], index: 4, kind: input, shape index: {}]   ;;  %s543_s5 = inlined_call_operand.hbm [shape: f32[16,32], index: 5, kind: output, shape index: {}]  }
   0x1   :  { %11 = vsyncpa [#allocation8], 0 }
   0x2   :  { %12 = vsyncpa [#allocation6], 0  ;;  %s416_s18 = smov [#allocation7]   ;;  %s417_s20 = smov [#allocation4]  }
   0x3   :  { %s30_s19 = sshll.u32 %s416_s18, 4  ;;  %s18_s21 = sshll.u32 %s417_s20, 4  ;;  %s31_s19 = int_to_ptr.vmem [resolvable:$true] %s30_s19  ;;  %s456_s21 = int_to_ptr.vmem [resolvable:$true] %s18_s21 }
   0x4   :  { %s322_s24 = scalar_lea.hbm %s539_s1, 256 }
   0x5   :  { %p323_p0 = scmp.ne.s32.totalorder %s539_s1, %s322_s24  ;;  %p326_p1 = scmp.lt.u32.totalorder %s322_s24, %s539_s1 }
   0x7   :  { %p328_p2 = pnand %p326_p1, %p323_p0 }
   0x9   :  { %331 = shalt.err (!%p328_p2)
}
   0xa   :  { %s332_s29 = scalar_lea.vmem %s31_s19, 256  ;;  %p337_p4 = scmp.lt.s32.totalorder %s31_s19, %s31_s19 }
   0xb   :  { %p333_p3 = scmp.ne.s32.totalorder %s31_s19, %s332_s29  ;;  %p338_p5 = scmp.lt.s32.totalorder %s332_s29, %s332_s29 }
   0xd   :  { %p339_p6 = por %p338_p5, %p337_p4 }
   0xf   :  { %p340_p7 = pnand %p339_p6, %p333_p3 }
  0x11   :  { %343 = shalt.err (!%p340_p7)
}
  0x12   :  { %s418_s30 = smov 64   ;;  %s419_s6 = smov 4  }
  0x13   :  { %36 = dma.hbm_to_vmem [thread:$0]  %s539_s1, 256, %s31_s19, [#allocation8], %s418_s30, %s418_s30, %s419_s6  }
  0x14   :  { %s344_s11 = scalar_lea.hbm %s538_s0, 128 }
  0x15   :  { %p345_p8 = scmp.ne.s32.totalorder %s538_s0, %s344_s11  ;;  %p348_p9 = scmp.lt.u32.totalorder %s344_s11, %s538_s0 }
  0x17   :  { %p350_p10 = pnand %p348_p9, %p345_p8 }
  0x19   :  { %353 = shalt.err (!%p350_p10)
}
  0x1a   :  { %s354_s16 = scalar_lea.vmem %s456_s21, 128  ;;  %p359_p12 = scmp.lt.s32.totalorder %s456_s21, %s456_s21 }
  0x1b   :  { %p355_p11 = scmp.ne.s32.totalorder %s456_s21, %s354_s16  ;;  %p360_p13 = scmp.lt.s32.totalorder %s354_s16, %s354_s16 }
  0x1d   :  { %p361_p0 = por %p360_p13, %p359_p12 }
  0x1f   :  { %p362_p1 = pnand %p361_p0, %p355_p11 }
  0x21   :  { %365 = shalt.err (!%p362_p1)
}
  0x22   :  { %24 = dma.hbm_to_vmem [thread:$0]  %s538_s0, 128, %s456_s21, [#allocation5], %s418_s30, %s418_s30, %s419_s6  }
  0x23   :  { %s420_s18 = smov [#allocation9]   ;;  %s366_s23 = scalar_lea.hbm %s540_s2, 256 }
  0x24   :  { %s42_s19 = sshll.u32 %s420_s18, 4  ;;  %p367_p2 = scmp.ne.s32.totalorder %s540_s2, %s366_s23  ;;  %s43_s19 = int_to_ptr.vmem [resolvable:$true] %s42_s19 }
  0x25   :  { %p370_p3 = scmp.lt.u32.totalorder %s366_s23, %s540_s2 }
  0x27   :  { %p372_p4 = pnand %p370_p3, %p367_p2 }
  0x29   :  { %375 = shalt.err (!%p372_p4)
}
  0x2a   :  { %s376_s28 = scalar_lea.vmem %s43_s19, 256  ;;  %p381_p6 = scmp.lt.s32.totalorder %s43_s19, %s43_s19 }
  0x2b   :  { %p377_p5 = scmp.ne.s32.totalorder %s43_s19, %s376_s28  ;;  %p382_p7 = scmp.lt.s32.totalorder %s376_s28, %s376_s28 }
  0x2d   :  { %p383_p8 = por %p382_p7, %p381_p6 }
  0x2f   :  { %p384_p9 = pnand %p383_p8, %p377_p5 }
  0x31   :  { %387 = shalt.err (!%p384_p9)
}
  0x32   :  { %48 = dma.hbm_to_vmem [thread:$0]  %s540_s2, 256, %s43_s19, [#allocation8], %s418_s30, %s418_s30, %s419_s6  }
  0x33   :  { %410 = dma.done.wait [#allocation5], 128  }
  0x34   :  { %411 = vsyncadd [#allocation5], 4294967168 }
  0x35   :  { %412 = dma.done.wait [#allocation8], 512  }
  0x36   :  { %413 = vsyncadd [#allocation8], 4294966784  ;;  %v421_v0 = vmov 0.0   ;;  %vm422_vm0 = vmmov 0   ;;  %v309_v1 = vld [vmem:[#allocation7] sm:$0xff]   ;;  %v310_v2 = vld [vmem:[#allocation7 + $0x8] sm:$0xff]  }
  0x37   :  { %283 = vmatprep.subr.bf16.mxu0 %v421_v0  ;;  %287 = vmatprep.mubr.msk.bf16.mxu0 %vm422_vm0, %v421_v0  ;;  %v312_v3 = vld [vmem:[#allocation9] sm:$0xff]   ;;  %vm74_vm1 = vcmask 261120   ;;  %v311_v4 = vld [vmem:[#allocation4] sm:$0xff]  }
  0x38   :  { %291 = vmatprep.subr.bf16.mxu1 %v421_v0  ;;  %295 = vmatprep.mubr.msk.bf16.mxu1 %vm422_vm0, %v421_v0  ;;  %v313_v5 = vld [vmem:[#allocation9 + $0x8] sm:$0xff]  }
  0x39   :  { %284 = vmatpush3.bf16.msra.mxu0 %v309_v1  ;;  %292 = vmatpush3.bf16.msra.mxu1 %v312_v3  ;;  %v266_v6 = vld [vmem:[%s541_s3] ss:$0 sm:$0xff]  ;;  %s423_s3 = smov [#allocation10]  }
  0x3a   :  { %285 = vmatprep.subr.bf16.mxu0 %v421_v0  ;;  %293 = vmatprep.subr.bf16.mxu1 %v421_v0  ;;  %75 = vst.msk [vmem:[#allocation2] sm:$0xff] %vm74_vm1, %v266_v6  ;;  %76 = vst.msk [vmem:[#allocation2 + $0x8] sm:$0xff] %vm74_vm1, %v266_v6  ;;  %v267_v7 = vld [vmem:[%s542_s4] ss:$0 sm:$0xff]  ;;  %s253_s4 = sshll.u32 %s423_s3, 4  ;;  %s254_s4 = int_to_ptr.vmem [resolvable:$true] %s253_s4 }
  0x3b   :  { %84 = vst.msk [vmem:[#allocation3] sm:$0xff] %vm74_vm1, %v267_v7  ;;  %85 = vst.msk [vmem:[#allocation3 + $0x8] sm:$0xff] %vm74_vm1, %v267_v7  ;;  %s388_s7 = scalar_lea.vmem %s254_s4, 256  ;;  %p393_p11 = scmp.lt.s32.totalorder %s254_s4, %s254_s4 }
  0x3c   :  { %p389_p10 = scmp.ne.s32.totalorder %s254_s4, %s388_s7  ;;  %p394_p12 = scmp.lt.s32.totalorder %s388_s7, %s388_s7 }
  0x3d   :  { %286 = vmatpush3.bf16.msra.mxu0 %v310_v2  ;;  %294 = vmatpush3.bf16.msra.mxu1 %v313_v5 }
  0x3e   :  { %p395_p13 = por %p394_p12, %p393_p11 }
  0x40   :  { %288 = vmatmul.mubr.msk.bf16.vlgmr.msra.gmra.mrb[0].mxu0 %vm74_vm1, %v311_v4  ;;  %296 = vmatmul.mubr.msk.bf16.vlgmr.msra.gmra.mrb[0].mxu1 %vm74_vm1, %v311_v4  ;;  %p396_p0 = pnand %p395_p13, %p389_p10 }
  0x41   :  { %v88_v8 = vld [vmem:[#allocation2] sm:$0xff]  ;;  %v89_v10 = vld [vmem:[#allocation2 + $0x8] sm:$0xff] }
  0x42   :  { %v160_v13 = vld [vmem:[#allocation3] sm:$0xff]  ;;  %v161_v18 = vld [vmem:[#allocation3 + $0x8] sm:$0xff] }
 0x113   :  { %v149_v9 = vpop.f32.mrb[0].mxu0  ;;  %v212_v17 = vpop.f32.mrb[0].mxu1 }
 0x114   :  { %v156_v11 = vadd.f32 %v149_v9, %v88_v8  ;;  %v289_v12 = vpop.f32.mrb[1].mxu0  ;;  %v219_v19 = vadd.f32 %v212_v17, %v160_v13  ;;  %v297_v20 = vpop.f32.mrb[1].mxu1 }
 0x115   :  { %v152_v14 = vpop.f32.mrb[2].mxu0  ;;  %v215_v21 = vpop.f32.mrb[2].mxu1 }
 0x116   :  { %158 = vst.msk [vmem:[#allocation2] sm:$0xff] %vm74_vm1, %v156_v11  ;;  %v157_v15 = vadd.f32 %v152_v14, %v89_v10  ;;  %v290_v16 = vpop.f32.mrb[3].mxu0  ;;  %221 = vst.msk [vmem:[#allocation3] sm:$0xff] %vm74_vm1, %v219_v19  ;;  %v220_v22 = vadd.f32 %v215_v21, %v161_v18  ;;  %v298_v23 = vpop.f32.mrb[3].mxu1 }
 0x118   :  { %159 = vst.msk [vmem:[#allocation2 + $0x8] sm:$0xff] %vm74_vm1, %v157_v15  ;;  %222 = vst.msk [vmem:[#allocation3 + $0x8] sm:$0xff] %vm74_vm1, %v220_v22 }
 0x11d   :  { %v226_v24 = vld [vmem:[#allocation2] sm:$0xff]  ;;  %v228_v33 = vld [vmem:[#allocation3] sm:$0xff] }
 0x11e   :  { %v275_v25 = vmul.f32 -1.442695, %v226_v24 }
 0x11f   :  { %v227_v26 = vld [vmem:[#allocation2 + $0x8] sm:$0xff]  ;;  %v229_v38 = vld [vmem:[#allocation3 + $0x8] sm:$0xff] }
 0x120   :  { %314 = vpow2.f32 %v275_v25  ;;  %v276_v27 = vmul.f32 -1.442695, %v227_v26 }
 0x122   :  { %316 = vpow2.f32 %v276_v27 }
 0x12a   :  { %v315_v28 = vpop.eup %314 }
 0x12b   :  { %v236_v29 = vadd.f32 1.0, %v315_v28 }
 0x12c   :  { %v317_v30 = vpop.eup %316 }
 0x12d   :  { %v237_v31 = vadd.f32 1.0, %v317_v30  ;;  %318 = vrcp.f32 %v236_v29 }
 0x12f   :  { %320 = vrcp.f32 %v237_v31 }
 0x137   :  { %v319_v32 = vpop.eup %318 }
 0x138   :  { %v242_v34 = vmul.f32 %v319_v32, %v226_v24 }
 0x139   :  { %v321_v35 = vpop.eup %320 }
 0x13a   :  { %v243_v36 = vmul.f32 %v321_v35, %v227_v26  ;;  %v244_v37 = vmul.f32 %v242_v34, %v228_v33 }
 0x13c   :  { %v245_v39 = vmul.f32 %v243_v36, %v229_v38  ;;  %246 = vst.msk [vmem:[#allocation10] sm:$0xff] %vm74_vm1, %v244_v37 }
 0x13e   :  { %247 = vst.msk [vmem:[#allocation10 + $0x8] sm:$0xff] %vm74_vm1, %v245_v39 }
 0x13f   :  { %399 = shalt.err (!%p396_p0)
}
 0x140   :  { %s400_s10 = scalar_lea.hbm %s543_s5, 256 }
 0x141   :  { %p401_p1 = scmp.ne.s32.totalorder %s543_s5, %s400_s10  ;;  %p404_p2 = scmp.lt.u32.totalorder %s400_s10, %s543_s5 }
 0x143   :  { %p406_p3 = pnand %p404_p2, %p401_p1 }
 0x145   :  { %409 = shalt.err (!%p406_p3)
}
 0x146   :  { %s424_s15 = smov 128   ;;  %s425_s16 = smov 8  }
 0x147   :  { %259 = dma.vmem_to_hbm [thread:$0]  %s254_s4, 256, %s543_s5, [#allocation6], %s424_s15, %s424_s15, %s425_s16  }
 0x148   :  { %414 = dma.done.wait [#allocation6], 256  }
 0x149   :  { %415 = vsyncadd [#allocation6], 4294967040 }
 0x14a   :  { %263 = vsyncpa [#allocation5], 1 }
 0x14b   :  { %264 = vsyncpa [#allocation8], 1 }
 0x14c   :  { %265 = vsyncpa [#allocation6], 1 }

</bundles_post_ra>
